<compile_context>
chip_gen: v7x
topology: tpu7x:2x2x1
jax: 0.10.0
libtpu: 0.0.40
codegen_flags: <defaults>
</compile_context>

<pallas_src>
import functools
import math

import jax
import jax.numpy as jnp
from jax.experimental import pallas as pl
from jax.experimental.pallas import tpu as pltpu

HIDDEN = 2048  # fixed in the PyTorch module

_INV_SQRT2 = 1.0 / math.sqrt(2.0)


def _round_up(x, m):
    return (x + m - 1) // m * m


# --------------------------------------------------------------------------
# Fused kernel: MLP + binary quantize + per-batch-tile commit-loss partial.
# Grid = (nb, nk); block index of q / loss depends only on i (accumulate over k).
# --------------------------------------------------------------------------
def _mlp_quant_kernel(x_ref, w1_ref, b1_ref, w2_ref, b2_ref,
                      q_ref, loss_ref, acc_ref, *, bm, b_real):
    # Read grid coordinates ONCE, outside any pl.when body.
    i = pl.program_id(0)
    k = pl.program_id(1)
    nk = pl.num_programs(1)

    @pl.when(k == 0)
    def _init():
        acc_ref[...] = jnp.zeros_like(acc_ref)

    # ---- Linear(start_dim, HIDDEN) k-slice: bf16 in, f32 MXU accumulation ----
    h = jnp.dot(x_ref[...], w1_ref[...], preferred_element_type=jnp.float32)
    h = h + b1_ref[...]                                   # (bm, bk) + (1, bk)
    # exact GELU (erf), in f32 (matches torch nn.GELU default; v5e EUP is f32-only)
    h = 0.5 * h * (1.0 + jax.lax.erf(h * _INV_SQRT2))

    # ---- Linear(HIDDEN, F) contraction slice: bf16 on the MXU, f32 accumulate ----
    acc_ref[...] += jnp.dot(h.astype(jnp.bfloat16), w2_ref[...],
                            preferred_element_type=jnp.float32)

    # ---- finalize: bias, binary quantize, masked commit-loss partial ----
    @pl.when(k == nk - 1)
    def _finalize():
        y = acc_ref[...] + b2_ref[...]                    # (bm, F_pad), f32
        # codebook {0.0, 1.0}: nearest neighbour == (y > 0.5); ties -> code 0
        q = jnp.where(y > 0.5, 1.0, 0.0)
        q_ref[...] = q.astype(q_ref.dtype)                # exact in bf16 ({0,1})

        # padded feature columns have w2 == 0 and b2 == 0 -> y == q == 0 exactly,
        # so they contribute nothing; only padded batch rows must be masked out.
        rows = jax.lax.broadcasted_iota(jnp.int32, (bm, 1), 0) + i * bm
        valid = rows < b_real
        sq = jnp.where(valid, (q - y) ** 2, 0.0)
        # one (8,128) block per batch tile; each element holds tile_sum/1024 so
        # the wrapper can use a plain full-array sum (1024 is exact in f32).
        loss_ref[...] = jnp.zeros((8, 128), jnp.float32) + jnp.sum(sq) * (1.0 / 1024.0)


# --------------------------------------------------------------------------
# One-time parameter preparation (hoisted out of the per-call path).
# --------------------------------------------------------------------------
def prepare_params(w1, b1, w2, b2):
    """Cast weights to bf16 once and zero-pad the feature dim to a multiple of 128."""
    hidden, F = w2.shape
    assert hidden == HIDDEN
    F_pad = _round_up(F, 128)
    w1_b = w1.astype(jnp.bfloat16)
    b1_r = b1.reshape(1, HIDDEN).astype(jnp.float32)
    w2_p = jnp.zeros((HIDDEN, F_pad), jnp.bfloat16).at[:, :F].set(w2.astype(jnp.bfloat16))
    b2_p = jnp.zeros((1, F_pad), jnp.float32).at[:, :F].set(
        b2.reshape(1, F).astype(jnp.float32))
    return {"w1": w1_b, "b1": b1_r, "w2": w2_p, "b2": b2_p,
            "features": F, "f_pad": F_pad}


# --------------------------------------------------------------------------
# Forward wrapper
# --------------------------------------------------------------------------
def resextr_forward(x, params, predicate_matrix):
    """Returns (quantized [B,F] f32, commit_loss scalar, predicate_matrix_q [C,F] f32)."""
    B, start_dim = x.shape
    F = params["features"]
    F_pad = params["f_pad"]

    # ---- tile sizes ----
    bm = min(512, _round_up(max(B, 8), 8))        # >=256 recommended on v6e/v7x for big B
    B_pad = _round_up(B, bm)
    nb = B_pad // bm
    # largest bk dividing HIDDEN whose bf16 w2 tile stays <= 4 MiB
    bk = 256
    for cand in (2048, 1024, 512, 256):
        if cand * F_pad * 2 <= 4 * 1024 * 1024:
            bk = cand
            break
    nk = HIDDEN // bk

    # batch is the only per-call tensor that needs casting / padding
    x_p = jnp.zeros((B_pad, start_dim), jnp.bfloat16).at[:B, :].set(x.astype(jnp.bfloat16))

    kernel = functools.partial(_mlp_quant_kernel, bm=bm, b_real=B)

    q_pad, loss_parts = pl.pallas_call(
        kernel,
        out_shape=(
            jax.ShapeDtypeStruct((B_pad, F_pad), jnp.bfloat16),   # binary features
            jax.ShapeDtypeStruct((nb * 8, 128), jnp.float32),     # loss partials
        ),
        grid=(nb, nk),
        in_specs=[
            pl.BlockSpec((bm, start_dim), lambda i, k: (i, 0)),   # x
            pl.BlockSpec((start_dim, bk), lambda i, k: (0, k)),   # w1
            pl.BlockSpec((1, bk),         lambda i, k: (0, k)),   # b1
            pl.BlockSpec((bk, F_pad),     lambda i, k: (k, 0)),   # w2
            pl.BlockSpec((1, F_pad),      lambda i, k: (0, 0)),   # b2
        ],
        out_specs=(
            pl.BlockSpec((bm, F_pad), lambda i, k: (i, 0)),       # q
            pl.BlockSpec((8, 128),    lambda i, k: (i, 0)),       # loss partials
        ),
        scratch_shapes=[pltpu.VMEM((bm, F_pad), jnp.float32)],    # f32 accumulator
        compiler_params=pltpu.CompilerParams(
            dimension_semantics=("parallel", "arbitrary"),
            vmem_limit_bytes=32 * 1024 * 1024,
        ),
    )(x_p, params["w1"], params["b1"], params["w2"], params["b2"])

    quantized = q_pad[:B, :F].astype(jnp.float32)
    commit1 = loss_parts.sum() / (B * F)          # mean over the real B*F elements

    # predicate-matrix quantization: a few KiB of elementwise work -> plain jnp
    pm = predicate_matrix.astype(jnp.float32)
    predicate_q = jnp.where(pm > 0.5, 1.0, 0.0)
    commit2 = jnp.mean((predicate_q - pm) ** 2)

    return quantized, commit1 + commit2, predicate_q


def init_params(key, start_dim, features, classes):
    k1, k2, k3, k4, k5 = jax.random.split(key, 5)
    # deterministic synthetic init (PyTorch-Linear-like scaling)
    w1 = jax.random.uniform(k1, (start_dim, HIDDEN), jnp.float32,
                            -1.0 / math.sqrt(start_dim), 1.0 / math.sqrt(start_dim))
    b1 = jax.random.uniform(k2, (HIDDEN,), jnp.float32,
                            -1.0 / math.sqrt(start_dim), 1.0 / math.sqrt(start_dim))
    w2 = jax.random.uniform(k3, (HIDDEN, features), jnp.float32,
                            -1.0 / math.sqrt(HIDDEN), 1.0 / math.sqrt(HIDDEN))
    b2 = jax.random.uniform(k4, (features,), jnp.float32,
                            -1.0 / math.sqrt(HIDDEN), 1.0 / math.sqrt(HIDDEN))
    predicate_matrix = jax.random.normal(k5, (classes, features), jnp.float32)
    return w1, b1, w2, b2, predicate_matrix


if __name__ == "__main__":
    batch, start_dim, features, classes = 2, 32, 16, 8

    key = jax.random.PRNGKey(0)
    kx, kp = jax.random.split(key)
    x = jax.random.normal(kx, (batch, start_dim), jnp.float32)
    w1, b1, w2, b2, pm = init_params(kp, start_dim, features, classes)

    params = prepare_params(w1, b1, w2, b2)       # one-time bf16 cast / padding
    quantized, commit_loss, predicate_q = resextr_forward(x, params, pm)
    jax.block_until_ready((quantized, commit_loss, predicate_q))

    # sanity: binary outputs, correct shapes, finite scalar loss
    assert quantized.shape == (batch, features)
    assert predicate_q.shape == (classes, features)
    assert commit_loss.shape == ()
    assert bool(jnp.all((quantized == 0.0) | (quantized == 1.0)))
    assert bool(jnp.all((predicate_q == 0.0) | (predicate_q == 1.0)))
    assert bool(jnp.isfinite(commit_loss))

    print("KERNEL_OK")
</pallas_src>

<mosaic_0001>
module attributes {stable_mosaic.version = 11 : i64} {
  func.func @_mlp_quant_kernel(%arg0: i32, %arg1: i32, %arg2: memref<8x32xbf16, #tpu.memory_space<vmem>>, %arg3: memref<32x2048xbf16, #tpu.memory_space<vmem>>, %arg4: memref<1x2048xf32, #tpu.memory_space<vmem>>, %arg5: memref<2048x128xbf16, #tpu.memory_space<vmem>>, %arg6: memref<1x128xf32, #tpu.memory_space<vmem>>, %arg7: memref<8x128xbf16, #tpu.memory_space<vmem>>, %arg8: memref<8x128xf32, #tpu.memory_space<vmem>>, %arg9: memref<8x128xf32, #tpu.memory_space<vmem>>) attributes {dimension_semantics = [#tpu.dimension_semantics<parallel>, #tpu.dimension_semantics<arbitrary>], iteration_bounds = array<i64: 1, 1>, scalar_prefetch = 0 : i64, scratch_operands = 1 : i64, tpu.core_type = #tpu.core_type<tc>, window_params = [{transform_indices = @transform_0, window_bounds = array<i64: 8, 32>}, {transform_indices = @transform_1, window_bounds = array<i64: 32, 2048>}, {transform_indices = @transform_2, window_bounds = array<i64: 1, 2048>}, {transform_indices = @transform_3, window_bounds = array<i64: 2048, 128>}, {pipeline_mode = #tpu.pipeline_mode<synchronous>, transform_indices = @transform_4, window_bounds = array<i64: 1, 128>}, {transform_indices = @transform_5, window_bounds = array<i64: 8, 128>}, {transform_indices = @transform_6, window_bounds = array<i64: 8, 128>}]} {
    %c0_i32 = arith.constant 0 : i32
    %0 = arith.cmpi eq, %arg1, %c0_i32 : i32
    %1 = arith.extui %0 : i1 to i32
    %c0_i32_0 = arith.constant 0 : i32
    %2 = arith.cmpi ne, %1, %c0_i32_0 : i32
    scf.if %2 {
      %cst_18 = arith.constant 0.000000e+00 : f32
      %26 = vector.broadcast %cst_18 : f32 to vector<8x128xf32>
      %c0_19 = arith.constant 0 : index
      %c0_20 = arith.constant 0 : index
      %27 = vector.load %arg9[%c0_19, %c0_20] : memref<8x128xf32, #tpu.memory_space<vmem>>, vector<8x128xf32>
      tpu.vector_store %arg9[%c0_19, %c0_20], %26 {strides = array<i32>} : memref<8x128xf32, #tpu.memory_space<vmem>>, vector<8x128xf32>,
    } else {
    }
    %c0 = arith.constant 0 : index
    %c0_1 = arith.constant 0 : index
    %3 = vector.load %arg2[%c0, %c0_1] : memref<8x32xbf16, #tpu.memory_space<vmem>>, vector<8x32xbf16>
    %c0_2 = arith.constant 0 : index
    %c0_3 = arith.constant 0 : index
    %4 = vector.load %arg3[%c0_2, %c0_3] : memref<32x2048xbf16, #tpu.memory_space<vmem>>, vector<32x2048xbf16>
    %cst = arith.constant dense<0.000000e+00> : vector<8x2048xf32>
    %5 = tpu.matmul %3, %4, %cst {dimension_numbers = #tpu.dot_dimension_numbers<[1], [0], [0], [1], [0, 0, 1, 1], [], []>} : vector<8x32xbf16>, vector<32x2048xbf16>, vector<8x2048xf32> -> vector<8x2048xf32>
    %c0_4 = arith.constant 0 : index
    %c0_5 = arith.constant 0 : index
    %6 = vector.load %arg4[%c0_4, %c0_5] : memref<1x2048xf32, #tpu.memory_space<vmem>>, vector<1x2048xf32>
    %7 = vector.broadcast %6 : vector<1x2048xf32> to vector<8x2048xf32>
    %8 = arith.addf %5, %7 : vector<8x2048xf32>
    %cst_6 = arith.constant 5.000000e-01 : f32
    %9 = vector.broadcast %cst_6 : f32 to vector<8x2048xf32>
    %10 = arith.mulf %9, %8 : vector<8x2048xf32>
    %cst_7 = arith.constant 0.707106769 : f32
    %11 = vector.broadcast %cst_7 : f32 to vector<8x2048xf32>
    %12 = arith.mulf %8, %11 : vector<8x2048xf32>
    %13 = math.erf %12 : vector<8x2048xf32>
    %cst_8 = arith.constant 1.000000e+00 : f32
    %14 = vector.broadcast %cst_8 : f32 to vector<8x2048xf32>
    %15 = arith.addf %14, %13 : vector<8x2048xf32>
    %16 = arith.mulf %10, %15 : vector<8x2048xf32>
    %c0_9 = arith.constant 0 : index
    %c0_10 = arith.constant 0 : index
    %17 = vector.load %arg9[%c0_9, %c0_10] : memref<8x128xf32, #tpu.memory_space<vmem>>, vector<8x128xf32>
    %18 = arith.truncf %16 : vector<8x2048xf32> to vector<8x2048xbf16>
    %c0_11 = arith.constant 0 : index
    %c0_12 = arith.constant 0 : index
    %19 = vector.load %arg5[%c0_11, %c0_12] : memref<2048x128xbf16, #tpu.memory_space<vmem>>, vector<2048x128xbf16>
    %cst_13 = arith.constant dense<0.000000e+00> : vector<8x128xf32>
    %20 = tpu.matmul %18, %19, %cst_13 {dimension_numbers = #tpu.dot_dimension_numbers<[1], [0], [0], [1], [0, 0, 1, 1], [], []>} : vector<8x2048xbf16>, vector<2048x128xbf16>, vector<8x128xf32> -> vector<8x128xf32>
    %21 = arith.addf %17, %20 : vector<8x128xf32>
    %c0_14 = arith.constant 0 : index
    %c0_15 = arith.constant 0 : index
    %22 = vector.load %arg9[%c0_14, %c0_15] : memref<8x128xf32, #tpu.memory_space<vmem>>, vector<8x128xf32>
    tpu.vector_store %arg9[%c0_14, %c0_15], %21 {strides = array<i32>} : memref<8x128xf32, #tpu.memory_space<vmem>>, vector<8x128xf32>,
    %c0_i32_16 = arith.constant 0 : i32
    %23 = arith.cmpi eq, %arg1, %c0_i32_16 : i32
    %24 = arith.extui %23 : i1 to i32
    %c0_i32_17 = arith.constant 0 : i32
    %25 = arith.cmpi ne, %24, %c0_i32_17 : i32
    scf.if %25 {
      %c0_18 = arith.constant 0 : index
      %c0_19 = arith.constant 0 : index
      %26 = vector.load %arg9[%c0_18, %c0_19] : memref<8x128xf32, #tpu.memory_space<vmem>>, vector<8x128xf32>
      %c0_20 = arith.constant 0 : index
      %c0_21 = arith.constant 0 : index
      %27 = vector.load %arg6[%c0_20, %c0_21] : memref<1x128xf32, #tpu.memory_space<vmem>>, vector<1x128xf32>
      %28 = vector.broadcast %27 : vector<1x128xf32> to vector<8x128xf32>
      %29 = arith.addf %26, %28 : vector<8x128xf32>
      %cst_22 = arith.constant 5.000000e-01 : f32
      %30 = vector.broadcast %cst_22 : f32 to vector<8x128xf32>
      %31 = arith.cmpf ogt, %29, %30 : vector<8x128xf32>
      %cst_23 = arith.constant 1.000000e+00 : f32
      %cst_24 = arith.constant 0.000000e+00 : f32
      %32 = vector.broadcast %cst_23 : f32 to vector<8x128xf32>
      %33 = vector.broadcast %cst_24 : f32 to vector<8x128xf32>
      %34 = arith.select %31, %32, %33 : vector<8x128xi1>, vector<8x128xf32>
      %35 = arith.truncf %34 : vector<8x128xf32> to vector<8x128xbf16>
      %c0_25 = arith.constant 0 : index
      %c0_26 = arith.constant 0 : index
      %36 = vector.load %arg7[%c0_25, %c0_26] : memref<8x128xbf16, #tpu.memory_space<vmem>>, vector<8x128xbf16>
      tpu.vector_store %arg7[%c0_25, %c0_26], %35 {strides = array<i32>} : memref<8x128xbf16, #tpu.memory_space<vmem>>, vector<8x128xbf16>,
      %37 = tpu.iota {dimensions = array<i32: 0>} : vector<8x1xi32>
      %c8_i32 = arith.constant 8 : i32
      %38 = arith.muli %arg0, %c8_i32 : i32
      %39 = vector.broadcast %38 : i32 to vector<8x1xi32>
      %40 = arith.addi %37, %39 : vector<8x1xi32>
      %c2_i32 = arith.constant 2 : i32
      %41 = vector.broadcast %c2_i32 : i32 to vector<8x1xi32>
      %42 = arith.cmpi slt, %40, %41 : vector<8x1xi32>
      %43 = arith.subf %34, %29 : vector<8x128xf32>
      %44 = arith.mulf %43, %43 : vector<8x128xf32>
      %cst_27 = arith.constant 0.000000e+00 : f32
      %45 = vector.shape_cast %42 : vector<8x1xi1> to vector<8x1xi1>
      %46 = vector.broadcast %45 : vector<8x1xi1> to vector<8x128xi1>
      %47 = vector.broadcast %cst_27 : f32 to vector<8x128xf32>
      %48 = arith.select %46, %44, %47 : vector<8x128xi1>, vector<8x128xf32>
      %cst_28 = arith.constant 0.000000e+00 : f32
      %49 = vector.broadcast %cst_28 : f32 to vector<8x128xf32>
      %50 = vector.shape_cast %48 : vector<8x128xf32> to vector<1x8x128xf32>
      %cst_29 = arith.constant dense<0.000000e+00> : vector<1xf32>
      %51 = vector.multi_reduction <add>, %50, %cst_29 [1, 2] : vector<1x8x128xf32> to vector<1xf32>
      %52 = vector.shape_cast %51 : vector<1xf32> to vector<1x1x1xf32>
      %53 = vector.extract %52[0, 0, 0] : f32 from vector<1x1x1xf32>
      %cst_30 = arith.constant 9.765625E-4 : f32
      %54 = arith.mulf %53, %cst_30 : f32
      %55 = vector.broadcast %54 : f32 to vector<8x128xf32>
      %56 = arith.addf %49, %55 : vector<8x128xf32>
      %c0_31 = arith.constant 0 : index
      %c0_32 = arith.constant 0 : index
      %57 = vector.load %arg8[%c0_31, %c0_32] : memref<8x128xf32, #tpu.memory_space<vmem>>, vector<8x128xf32>
      tpu.vector_store %arg8[%c0_31, %c0_32], %56 {strides = array<i32>} : memref<8x128xf32, #tpu.memory_space<vmem>>, vector<8x128xf32>,
    } else {
    }
    return
  }
  func.func @transform_0(%arg0: i32, %arg1: i32) -> (i32, i32) {
    %c0_i32 = arith.constant 0 : i32
    %c0_i32_0 = arith.constant 0 : i32
    return %arg0, %c0_i32 : i32, i32
  }
  func.func @transform_1(%arg0: i32, %arg1: i32) -> (i32, i32) {
    %c0_i32 = arith.constant 0 : i32
    %c0_i32_0 = arith.constant 0 : i32
    return %c0_i32, %arg1 : i32, i32
  }
  func.func @transform_2(%arg0: i32, %arg1: i32) -> (i32, i32) {
    %c0_i32 = arith.constant 0 : i32
    %c0_i32_0 = arith.constant 0 : i32
    return %c0_i32, %arg1 : i32, i32
  }
  func.func @transform_3(%arg0: i32, %arg1: i32) -> (i32, i32) {
    %c0_i32 = arith.constant 0 : i32
    %c0_i32_0 = arith.constant 0 : i32
    return %arg1, %c0_i32 : i32, i32
  }
  func.func @transform_4(%arg0: i32, %arg1: i32) -> (i32, i32) {
    %c0_i32 = arith.constant 0 : i32
    %c0_i32_0 = arith.constant 0 : i32
    %c0_i32_1 = arith.constant 0 : i32
    return %c0_i32, %c0_i32_0 : i32, i32
  }
  func.func @transform_5(%arg0: i32, %arg1: i32) -> (i32, i32) {
    %c0_i32 = arith.constant 0 : i32
    %c0_i32_0 = arith.constant 0 : i32
    return %arg0, %c0_i32 : i32, i32
  }
  func.func @transform_6(%arg0: i32, %arg1: i32) -> (i32, i32) {
    %c0_i32 = arith.constant 0 : i32
    %c0_i32_0 = arith.constant 0 : i32
    return %arg0, %c0_i32 : i32, i32
  }
}

</mosaic_0001>

<bundles_post_ra>
// kernel: tpu_custom_call.1
= control target key start
LH: loop header
LB: loop body
LE: loop exit
PB: predicated region body
PF: predicated region fallthrough
CT: control target
= control target key end

     0   :  { %12 = vsyncpa [#allocation4], 0  ;;  %s3105_s0 = inlined_call_operand.hbm [shape: bf16[8,32], index: 0, kind: input, shape index: {}]   ;;  %s3106_s1 = inlined_call_operand.hbm [shape: bf16[32,2048], index: 1, kind: input, shape index: {}]   ;;  %s3107_s2 = inlined_call_operand.hbm [shape: f32[1,2048], index: 2, kind: input, shape index: {}]   ;;  %s3108_s3 = inlined_call_operand.hbm [shape: bf16[2048,128], index: 3, kind: input, shape index: {}]   ;;  %s3109_s4 = inlined_call_operand.vmem [shape: f32[1,128], index: 4, kind: input, shape index: {}]   ;;  %s3110_s5 = inlined_call_operand.hbm [shape: bf16[8,128], index: 5, kind: output, shape index: {0}]   ;;  %s3111_s6 = inlined_call_operand.hbm [shape: f32[8,128], index: 6, kind: output, shape index: {1}]  }
   0x1   :  { %13 = vsyncpa [#allocation7], 0 }
   0x2   :  { %14 = vsyncpa [#allocation10], 0 }
   0x3   :  { %15 = vsyncpa [#allocation5], 0 }
   0x4   :  { %16 = vsyncpa [#allocation13], 0  ;;  %s2864_s21 = smov [#allocation6]   ;;  %s2722_s25 = scalar_lea.hbm %s3106_s1, 4096 }
   0x5   :  { %s32_s22 = sshll.u32 %s2864_s21, 4  ;;  %p2723_p0 = scmp.ne.s32.totalorder %s3106_s1, %s2722_s25  ;;  %s33_s22 = int_to_ptr.vmem [resolvable:$true] %s32_s22 }
   0x6   :  { %p2726_p1 = scmp.lt.u32.totalorder %s2722_s25, %s3106_s1 }
   0x8   :  { %p2728_p2 = pnand %p2726_p1, %p2723_p0 }
   0xa   :  { %2731 = shalt.err (!%p2728_p2)
}
   0xb   :  { %s2732_s30 = scalar_lea.vmem %s33_s22, 4096  ;;  %p2737_p4 = scmp.lt.s32.totalorder %s33_s22, %s33_s22 }
   0xc   :  { %p2733_p3 = scmp.ne.s32.totalorder %s33_s22, %s2732_s30  ;;  %p2738_p5 = scmp.lt.s32.totalorder %s2732_s30, %s2732_s30 }
   0xe   :  { %p2739_p6 = por %p2738_p5, %p2737_p4 }
  0x10   :  { %p2740_p7 = pnand %p2739_p6, %p2733_p3 }
  0x12   :  { %2743 = shalt.err (!%p2740_p7)
}
  0x13   :  { %s2865_s7 = smov 1024   ;;  %s2866_s8 = smov 64  }
  0x14   :  { %38 = dma.hbm_to_vmem [thread:$0]  %s3106_s1, 4096, %s33_s22, [#allocation7], %s2865_s7, %s2865_s7, %s2866_s8  }
  0x15   :  { %s2867_s11 = smov [#allocation3]   ;;  %s2868_s13 = smov [#allocation8]  }
  0x16   :  { %s23_s12 = sshll.u32 %s2867_s11, 4  ;;  %s45_s14 = sshll.u32 %s2868_s13, 4  ;;  %s24_s12 = int_to_ptr.vmem [resolvable:$true] %s23_s12  ;;  %s46_s14 = int_to_ptr.vmem [resolvable:$true] %s45_s14 }
  0x17   :  { %s2744_s17 = scalar_lea.hbm %s3105_s0, 64 }
  0x18   :  { %p2745_p8 = scmp.ne.s32.totalorder %s3105_s0, %s2744_s17  ;;  %p2748_p9 = scmp.lt.u32.totalorder %s2744_s17, %s3105_s0 }
  0x1a   :  { %p2750_p10 = pnand %p2748_p9, %p2745_p8 }
  0x1c   :  { %2753 = shalt.err (!%p2750_p10)
}
  0x1d   :  { %s2754_s1 = scalar_lea.vmem %s24_s12, 64  ;;  %p2759_p12 = scmp.lt.s32.totalorder %s24_s12, %s24_s12 }
  0x1e   :  { %p2755_p11 = scmp.ne.s32.totalorder %s24_s12, %s2754_s1  ;;  %p2760_p13 = scmp.lt.s32.totalorder %s2754_s1, %s2754_s1 }
  0x20   :  { %p2761_p0 = por %p2760_p13, %p2759_p12 }
  0x22   :  { %p2762_p1 = pnand %p2761_p0, %p2755_p11 }
  0x24   :  { %2765 = shalt.err (!%p2762_p1)
}
  0x25   :  { %26 = dma.hbm_to_vmem [thread:$0]  %s3105_s0, 64, %s24_s12, [#allocation4]  }
  0x26   :  { %s2766_s26 = scalar_lea.hbm %s3107_s2, 256 }
  0x27   :  { %p2767_p2 = scmp.ne.s32.totalorder %s3107_s2, %s2766_s26  ;;  %p2770_p3 = scmp.lt.u32.totalorder %s2766_s26, %s3107_s2 }
  0x29   :  { %p2772_p4 = pnand %p2770_p3, %p2767_p2 }
  0x2b   :  { %2775 = shalt.err (!%p2772_p4)
}
  0x2c   :  { %s2776_s7 = scalar_lea.vmem %s46_s14, 256  ;;  %p2781_p6 = scmp.lt.s32.totalorder %s46_s14, %s46_s14 }
  0x2d   :  { %p2777_p5 = scmp.ne.s32.totalorder %s46_s14, %s2776_s7  ;;  %p2782_p7 = scmp.lt.s32.totalorder %s2776_s7, %s2776_s7 }
  0x2f   :  { %p2783_p8 = por %p2782_p7, %p2781_p6 }
  0x31   :  { %p2784_p9 = pnand %p2783_p8, %p2777_p5 }
  0x33   :  { %2787 = shalt.err (!%p2784_p9)
}
  0x34   :  { %48 = dma.hbm_to_vmem [thread:$0]  %s3107_s2, 256, %s46_s14, [#allocation7]  }
  0x35   :  { %s2869_s10 = smov [#allocation9]   ;;  %s2788_s15 = scalar_lea.hbm %s3108_s3, 16384 }
  0x36   :  { %s54_s11 = sshll.u32 %s2869_s10, 4  ;;  %p2789_p10 = scmp.ne.s32.totalorder %s3108_s3, %s2788_s15  ;;  %s55_s11 = int_to_ptr.vmem [resolvable:$true] %s54_s11 }
  0x37   :  { %p2792_p11 = scmp.lt.u32.totalorder %s2788_s15, %s3108_s3 }
  0x39   :  { %p2794_p12 = pnand %p2792_p11, %p2789_p10 }
  0x3b   :  { %2797 = shalt.err (!%p2794_p12)
}
  0x3c   :  { %s2798_s20 = scalar_lea.vmem %s55_s11, 16384  ;;  %p2803_p0 = scmp.lt.s32.totalorder %s55_s11, %s55_s11 }
  0x3d   :  { %p2799_p13 = scmp.ne.s32.totalorder %s55_s11, %s2798_s20  ;;  %p2804_p1 = scmp.lt.s32.totalorder %s2798_s20, %s2798_s20 }
  0x3f   :  { %p2805_p2 = por %p2804_p1, %p2803_p0 }
  0x41   :  { %p2806_p3 = pnand %p2805_p2, %p2799_p13 }
  0x43   :  { %2809 = shalt.err (!%p2806_p3)
}
  0x44   :  { %s2870_s2 = smov 4  }
  0x45   :  { %60 = dma.hbm_to_vmem [thread:$0]  %s3108_s3, 16384, %s55_s11, [#allocation10], %s2866_s8, %s2866_s8, %s2870_s2  }
  0x46   :  { %2854 = dma.done.wait [#allocation4], 64  }
  0x47   :  { %2855 = vsyncadd [#allocation4], 4294967232 }
  0x48   :  { %2856 = dma.done.wait [#allocation7], 4352  }
  0x49   :  { %2857 = vsyncadd [#allocation7], 4294962944 }
  0x4a   :  { %2858 = dma.done.wait [#allocation10], 16384  }
  0x4b   :  { %2859 = vsyncadd [#allocation10], 4294950912  ;;  %v2871_v0 = vmov 0   ;;  %v82_v1 = vld [vmem:[#allocation6] sm:$0xff]  ;;  %v83_v3 = vld [vmem:[#allocation6 + $0x8] sm:$0xff]  ;;  %vm358_vm0 = vcmask 261120  }
  0x4c   :  { %394 = vmatprep.mubr.bf16.mxu0 %v2871_v0  ;;  %435 = vmatprep.mubr.bf16.mxu1 %v2871_v0  ;;  %v90_v2 = vld [vmem:[#allocation6 + $0x40] sm:$0xff]  ;;  %v91_v5 = vld [vmem:[#allocation6 + $0x48] sm:$0xff]  ;;  %v84_v15 = vld [vmem:[#allocation6 + $0x10] sm:$0xff]  ;;  %s2873_s1 = smov [#allocation11]  }
  0x4d   :  { %v2205_v4 = vcombine.high %v82_v1, %v90_v2  ;;  %v2204_v6 = vcombine.low %v82_v1, %v90_v2  ;;  %v98_v7 = vld [vmem:[#allocation6 + $0x80] sm:$0xff]  ;;  %v2207_v9 = vcombine.high %v83_v3, %v91_v5  ;;  %v2206_v10 = vcombine.low %v83_v3, %v91_v5  ;;  %v99_v12 = vld [vmem:[#allocation6 + $0x88] sm:$0xff]  ;;  %v92_v16 = vld [vmem:[#allocation6 + $0x50] sm:$0xff]  ;;  %s2179_s22 = sshll.u32 %s2873_s1, 4  ;;  %s2180_s22 = int_to_ptr.vmem [resolvable:$true] %s2179_s22 }
  0x4e   :  { %v106_v8 = vld [vmem:[#allocation6 + $0xc0] sm:$0xff]  ;;  %v107_v13 = vld [vmem:[#allocation6 + $0xc8] sm:$0xff]  ;;  %v85_v17 = vld [vmem:[#allocation6 + $0x18] sm:$0xff]  ;;  %v2209_v21 = vcombine.high %v84_v15, %v92_v16  ;;  %v2208_v28 = vcombine.low %v84_v15, %v92_v16  ;;  %s2810_s23 = scalar_lea.vmem %s2180_s22, 64  ;;  %p2815_p5 = scmp.lt.s32.totalorder %s2180_s22, %s2180_s22 }
  0x4f   :  { %v2221_v11 = vcombine.high %v98_v7, %v106_v8  ;;  %362 = vmatprep.subr.bf16.mxu0 %v2205_v4  ;;  %v2223_v14 = vcombine.high %v99_v12, %v107_v13  ;;  %403 = vmatprep.subr.bf16.mxu1 %v2207_v9  ;;  %v2220_v18 = vcombine.low %v98_v7, %v106_v8  ;;  %v93_v19 = vld [vmem:[#allocation6 + $0x58] sm:$0xff]  ;;  %v100_v23 = vld [vmem:[#allocation6 + $0x90] sm:$0xff]  ;;  %v86_v32 = vld [vmem:[#allocation6 + $0x20] sm:$0xff]  ;;  %p2811_p4 = scmp.ne.s32.totalorder %s2180_s22, %s2810_s23  ;;  %p2816_p6 = scmp.lt.s32.totalorder %s2810_s23, %s2810_s23 }
  0x50   :  { %363 = vmatpush1.bf16.msra.mxu0 %v2204_v6  ;;  %404 = vmatpush1.bf16.msra.mxu1 %v2206_v10  ;;  %v2222_v20 = vcombine.low %v99_v12, %v107_v13  ;;  %v2211_v22 = vcombine.high %v85_v17, %v93_v19  ;;  %v108_v24 = vld [vmem:[#allocation6 + $0xd0] sm:$0xff]  ;;  %v101_v25 = vld [vmem:[#allocation6 + $0x98] sm:$0xff]  ;;  %v2210_v29 = vcombine.low %v85_v17, %v93_v19  ;;  %v94_v33 = vld [vmem:[#allocation6 + $0x60] sm:$0xff] }
  0x51   :  { %364 = vmatprep.subr.bf16.mxu0 %v2221_v11  ;;  %405 = vmatprep.subr.bf16.mxu1 %v2223_v14  ;;  %v109_v26 = vld [vmem:[#allocation6 + $0xd8] sm:$0xff]  ;;  %v2225_v30 = vcombine.high %v100_v23, %v108_v24  ;;  %v87_v34 = vld [vmem:[#allocation6 + $0x28] sm:$0xff]  ;;  %v2224_v36 = vcombine.low %v100_v23, %v108_v24  ;;  %v102_v37 = vld [vmem:[#allocation6 + $0xa0] sm:$0xff]  ;;  %v2213_v39 = vcombine.high %v86_v32, %v94_v33  ;;  %p2817_p7 = por %p2816_p6, %p2815_p5 }
  0x52   :  { %v2963_v27 = vld [vmem:[#allocation3] sm:$0xf]  ;;  %v2227_v31 = vcombine.high %v101_v25, %v109_v26  ;;  %v95_v35 = vld [vmem:[#allocation6 + $0x68] sm:$0xff]  ;;  %v2226_v38 = vcombine.low %v101_v25, %v109_v26  ;;  %v110_v40 = vld [vmem:[#allocation6 + $0xe0] sm:$0xff]  ;;  %v2212_v44 = vcombine.low %v86_v32, %v94_v33 }
  0x53   :  { %v2215_v41 = vcombine.high %v87_v34, %v95_v35  ;;  %v103_v42 = vld [vmem:[#allocation6 + $0xa8] sm:$0xff]  ;;  %v88_v45 = vld [vmem:[#allocation6 + $0x30] sm:$0xff]  ;;  %v2214_v46 = vcombine.low %v87_v34, %v95_v35  ;;  %v2229_v47 = vcombine.high %v102_v37, %v110_v40  ;;  %v89_v50 = vld [vmem:[#allocation6 + $0x38] sm:$0xff]  ;;  %v2228_v52 = vcombine.low %v102_v37, %v110_v40  ;;  %p2818_p8 = pnand %p2817_p7, %p2811_p4 }
  0x54   :  { %365 = vmatpush1.bf16.msra.mxu0 %v2220_v18  ;;  %406 = vmatpush1.bf16.msra.mxu1 %v2222_v20  ;;  %v111_v43 = vld [vmem:[#allocation6 + $0xe8] sm:$0xff]  ;;  %v96_v48 = vld [vmem:[#allocation6 + $0x70] sm:$0xff]  ;;  %v97_v51 = vld [vmem:[#allocation6 + $0x78] sm:$0xff] }
  0x55   :  { %444 = vmatprep.subr.bf16.mxu0 %v2209_v21  ;;  %485 = vmatprep.subr.bf16.mxu1 %v2211_v22  ;;  %v2231_v49 = vcombine.high %v103_v42, %v111_v43  ;;  %v104_v53 = vld [vmem:[#allocation6 + $0xb0] sm:$0xff]  ;;  %v2230_v55 = vcombine.low %v103_v42, %v111_v43  ;;  %v2217_v56 = vcombine.high %v88_v45, %v96_v48  ;;  %v105_v57 = vld [vmem:[#allocation6 + $0xb8] sm:$0xff]  ;;  %v2570_v11 = vld [vmem:[#allocation9 + $0x50] sm:$0xff]  }
  0x56   :  { %v112_v54 = vld [vmem:[#allocation6 + $0xf0] sm:$0xff]  ;;  %v113_v58 = vld [vmem:[#allocation6 + $0xf8] sm:$0xff]  ;;  %v2219_v59 = vcombine.high %v89_v50, %v97_v51  ;;  %v2216_v60 = vcombine.low %v88_v45, %v96_v48  ;;  %v2218_v61 = vcombine.low %v89_v50, %v97_v51  ;;  %v2571_v12 = vld [vmem:[#allocation9 + $0xd0] sm:$0xff]  }
  0x57   :  { %2236 = vmatmul.mubr.msk.bf16.vlgmr.msra.gmra.mrb[0].mxu0 %vm358_vm0, %v2963_v27  ;;  %2237 = vmatmul.mubr.msk.bf16.vlgmr.msra.gmra.mrb[0].mxu1 %vm358_vm0, %v2963_v27  ;;  %v2233_v62 = vcombine.high %v104_v53, %v112_v54  ;;  %v2235_v63 = vcombine.high %v105_v57, %v113_v58  ;;  %v2562_v1 = vld [vmem:[#allocation9 + $0x40] sm:$0xff]   ;;  %v2232_v2 = vcombine.low %v104_v53, %v112_v54  ;;  %v2566_v7 = vld [vmem:[#allocation9 + $0x48] sm:$0xff]   ;;  %v2573_v13 = vld [vmem:[#allocation9 + $0x90] sm:$0xff]  }
  0x58   :  { %445 = vmatpush1.bf16.msra.mxu0 %v2208_v28  ;;  %486 = vmatpush1.bf16.msra.mxu1 %v2210_v29  ;;  %v2563_v3 = vld [vmem:[#allocation9 + $0xc0] sm:$0xff]   ;;  %v2234_v4 = vcombine.low %v105_v57, %v113_v58  ;;  %v2567_v8 = vld [vmem:[#allocation9 + $0xc8] sm:$0xff]   ;;  %v2574_v14 = vld [vmem:[#allocation9 + $0x58] sm:$0xff]  }
  0x59   :  { %446 = vmatprep.subr.bf16.mxu0 %v2225_v30  ;;  %487 = vmatprep.subr.bf16.mxu1 %v2227_v31  ;;  %v2564_v5 = vld [vmem:[#allocation9] sm:$0xff]   ;;  %v2568_v9 = vld [vmem:[#allocation9 + $0x8] sm:$0xff]   ;;  %v2575_v15 = vld [vmem:[#allocation9 + $0xd8] sm:$0xff]  }
  0x5a   :  { %476 = vmatprep.mubr.bf16.mxu0 %v2871_v0  ;;  %517 = vmatprep.mubr.bf16.mxu1 %v2871_v0  ;;  %v2565_v6 = vld [vmem:[#allocation9 + $0x80] sm:$0xff]   ;;  %v2569_v10 = vld [vmem:[#allocation9 + $0x88] sm:$0xff]   ;;  %v2576_v16 = vld [vmem:[#allocation9 + $0x18] sm:$0xff]  }
  0x5b   :  { %v2577_v17 = vld [vmem:[#allocation9 + $0x98] sm:$0xff]   ;;  %v2578_v18 = vld [vmem:[#allocation9 + $0x60] sm:$0xff]   ;;  %v2582_v22 = vld [vmem:[#allocation9 + $0x68] sm:$0xff]  }
  0x5c   :  { %447 = vmatpush1.bf16.msra.mxu0 %v2224_v36  ;;  %488 = vmatpush1.bf16.msra.mxu1 %v2226_v38  ;;  %v2579_v19 = vld [vmem:[#allocation9 + $0xe0] sm:$0xff]   ;;  %v2583_v23 = vld [vmem:[#allocation9 + $0xe8] sm:$0xff]   ;;  %v2586_v26 = vld [vmem:[#allocation9 + $0x70] sm:$0xff]   ;;  %v118_v36 = vlaneseq }
  0x5d   :  { %526 = vmatprep.subr.bf16.mxu0 %v2213_v39  ;;  %567 = vmatprep.subr.bf16.mxu1 %v2215_v41  ;;  %v2580_v20 = vld [vmem:[#allocation9 + $0x20] sm:$0xff]   ;;  %v2584_v24 = vld [vmem:[#allocation9 + $0x28] sm:$0xff]   ;;  %v2588_v28 = vld [vmem:[#allocation9 + $0x30] sm:$0xff]  }
  0x5e   :  { %v2581_v21 = vld [vmem:[#allocation9 + $0xa0] sm:$0xff]   ;;  %v2585_v25 = vld [vmem:[#allocation9 + $0xa8] sm:$0xff]   ;;  %v2589_v29 = vld [vmem:[#allocation9 + $0xb0] sm:$0xff]   ;;  %v2987_v37 = vshrl.u32 %v118_v36, 7 }
  0x5f   :  { %2238 = vmatmul.mubr.msk.bf16.vlgmr.msra.gmra.mrb[4].mxu0 %vm358_vm0, %v2963_v27  ;;  %2239 = vmatmul.mubr.msk.bf16.vlgmr.msra.gmra.mrb[4].mxu1 %vm358_vm0, %v2963_v27  ;;  %v2590_v30 = vld [vmem:[#allocation9 + $0x78] sm:$0xff]   ;;  %v2594_v34 = vld [vmem:[#allocation9 + $0x140] sm:$0xff]   ;;  %v2990_v39 = vld [vmem:[#allocation8] sm:$0xff] }
  0x60   :  { %527 = vmatpush1.bf16.msra.mxu0 %v2212_v44  ;;  %568 = vmatpush1.bf16.msra.mxu1 %v2214_v46  ;;  %v2591_v31 = vld [vmem:[#allocation9 + $0xf8] sm:$0xff]   ;;  %v2595_v35 = vld [vmem:[#allocation9 + $0x1c0] sm:$0xff]   ;;  %v120_v38 = vsub.s32 0, %v2987_v37  ;;  %v128_v40 = vsub.s32 2, %v2987_v37  ;;  %v124_v41 = vsub.s32 1, %v2987_v37  ;;  %v132_v42 = vsub.s32 3, %v2987_v37 }
  0x61   :  { %528 = vmatprep.subr.bf16.mxu0 %v2229_v47  ;;  %569 = vmatprep.subr.bf16.mxu1 %v2231_v49  ;;  %v2592_v32 = vld [vmem:[#allocation9 + $0x38] sm:$0xff]   ;;  %vm2154_vm2 = vcmp.lt.s32.totalorder %v2987_v37, 2 }
  0x62   :  { %558 = vmatprep.mubr.bf16.mxu0 %v2871_v0  ;;  %599 = vmatprep.mubr.bf16.mxu1 %v2871_v0  ;;  %v2593_v33 = vld [vmem:[#allocation9 + $0xb8] sm:$0xff]   ;;  %v121_v43 = vrot.slane %v2990_v39, %v120_v38  ;;  %v129_v44 = vrot.slane %v2990_v39, %v128_v40  ;;  %v125_v45 = vrot.slane %v2990_v39, %v124_v41 }
  0x63   :  { %v133_v46 = vrot.slane %v2990_v39, %v132_v42 }
  0x64   :  { %529 = vmatpush1.bf16.msra.mxu0 %v2228_v52  ;;  %570 = vmatpush1.bf16.msra.mxu1 %v2230_v55  ;;  %v140_v55 = vsub.s32 5, %v2987_v37 }
  0x65   :  { %608 = vmatprep.subr.bf16.mxu0 %v2217_v56  ;;  %649 = vmatprep.subr.bf16.mxu1 %v2219_v59 }
  0x67   :  { %2240 = vmatmul.mubr.msk.bf16.vlgmr.msra.gmra.mrb[8].mxu0 %vm358_vm0, %v2963_v27  ;;  %2241 = vmatmul.mubr.msk.bf16.vlgmr.msra.gmra.mrb[8].mxu1 %vm358_vm0, %v2963_v27 }
  0x68   :  { %609 = vmatpush1.bf16.msra.mxu0 %v2216_v60  ;;  %650 = vmatpush1.bf16.msra.mxu1 %v2218_v61  ;;  %v148_v60 = vsub.s32 7, %v2987_v37 }
  0x69   :  { %610 = vmatprep.subr.bf16.mxu0 %v2233_v62  ;;  %651 = vmatprep.subr.bf16.mxu1 %v2235_v63 }
  0x6a   :  { %640 = vmatprep.mubr.bf16.mxu0 %v2871_v0  ;;  %681 = vmatprep.mubr.bf16.mxu1 %v2871_v0  ;;  %v2572_v0 = vld [vmem:[#allocation9 + $0x10] sm:$0xff]  }
  0x6c   :  { %611 = vmatpush1.bf16.msra.mxu0 %v2232_v2  ;;  %652 = vmatpush1.bf16.msra.mxu1 %v2234_v4  ;;  %v141_v2 = vrot.slane %v2990_v39, %v140_v55 }
  0x6d   :  { %2373 = vmatprep.subr.bf16.mxu0 %v2562_v1  ;;  %2395 = vmatprep.subr.bf16.mxu1 %v2563_v3  ;;  %v149_v3 = vrot.slane %v2990_v39, %v148_v60 }
  0x6f   :  { %2242 = vmatmul.mubr.msk.bf16.vlgmr.msra.gmra.mrb[12].mxu0 %vm358_vm0, %v2963_v27  ;;  %2243 = vmatmul.mubr.msk.bf16.vlgmr.msra.gmra.mrb[12].mxu1 %vm358_vm0, %v2963_v27  ;;  %v2587_v27 = vld [vmem:[#allocation9 + $0xf0] sm:$0xff]  }
  0x70   :  { %2374 = vmatpush3.bf16.msra.mxu0 %v2564_v5  ;;  %2396 = vmatpush3.bf16.msra.mxu1 %v2565_v6 }
  0x71   :  { %2375 = vmatprep.subr.bf16.mxu0 %v2566_v7  ;;  %2397 = vmatprep.subr.bf16.mxu1 %v2567_v8 }
  0x74   :  { %2376 = vmatpush3.bf16.msra.mxu0 %v2568_v9  ;;  %2398 = vmatpush3.bf16.msra.mxu1 %v2569_v10  ;;  %v3015_v10 = vld [vmem:[#allocation8 + $0x8] sm:$0xff] }
  0x75   :  { %2377 = vmatprep.subr.bf16.mxu0 %v2570_v11  ;;  %2399 = vmatprep.subr.bf16.mxu1 %v2571_v12 }
  0x78   :  { %2378 = vmatpush3.bf16.msra.mxu0 %v2572_v0  ;;  %2400 = vmatpush3.bf16.msra.mxu1 %v2573_v13 }
  0x79   :  { %2379 = vmatprep.subr.bf16.mxu0 %v2574_v14  ;;  %2401 = vmatprep.subr.bf16.mxu1 %v2575_v15 }
  0x7c   :  { %2380 = vmatpush3.bf16.msra.mxu0 %v2576_v16  ;;  %2402 = vmatpush3.bf16.msra.mxu1 %v2577_v17  ;;  %v153_v16 = vrot.slane %v3015_v10, %v120_v38  ;;  %v161_v17 = vrot.slane %v3015_v10, %v128_v40 }
  0x7d   :  { %2381 = vmatprep.subr.bf16.mxu0 %v2578_v18  ;;  %2403 = vmatprep.subr.bf16.mxu1 %v2579_v19 }
  0x80   :  { %2382 = vmatpush3.bf16.msra.mxu0 %v2580_v20  ;;  %2404 = vmatpush3.bf16.msra.mxu1 %v2581_v21  ;;  %v136_v21 = vsub.s32 4, %v2987_v37 }
  0x81   :  { %2383 = vmatprep.subr.bf16.mxu0 %v2582_v22  ;;  %2405 = vmatprep.subr.bf16.mxu1 %v2583_v23 }
  0x84   :  { %2384 = vmatpush3.bf16.msra.mxu0 %v2584_v24  ;;  %2406 = vmatpush3.bf16.msra.mxu1 %v2585_v25 }
  0x85   :  { %2385 = vmatprep.subr.bf16.mxu0 %v2586_v26  ;;  %2407 = vmatprep.subr.bf16.mxu1 %v2587_v27  ;;  %v144_v26 = vsub.s32 6, %v2987_v37 }
  0x88   :  { %2386 = vmatpush3.bf16.msra.mxu0 %v2588_v28  ;;  %2408 = vmatpush3.bf16.msra.mxu1 %v2589_v29 }
  0x89   :  { %2387 = vmatprep.subr.bf16.mxu0 %v2590_v30  ;;  %2409 = vmatprep.subr.bf16.mxu1 %v2591_v31 }
  0x8c   :  { %2388 = vmatpush3.bf16.msra.mxu0 %v2592_v32  ;;  %2410 = vmatpush3.bf16.msra.mxu1 %v2593_v33 }
  0x8d   :  { %2417 = vmatprep.subr.bf16.mxu0 %v2594_v34  ;;  %2439 = vmatprep.subr.bf16.mxu1 %v2595_v35 }
 0x12a   :  { %v396_v47 = vpop.f32.mrb[0].mxu0  ;;  %v437_v49 = vpop.f32.mrb[0].mxu1 }
 0x12b   :  { %v397_v48 = vadd.f32 %v396_v47, %v121_v43  ;;  %v398_v50 = vpop.f32.mrb[1].mxu0  ;;  %v438_v51 = vadd.f32 %v437_v49, %v129_v44  ;;  %v439_v53 = vpop.f32.mrb[1].mxu1  ;;  %v137_v49 = vrot.slane %v2990_v39, %v136_v21 }
 0x12c   :  { %v399_v52 = vadd.f32 %v398_v50, %v125_v45  ;;  %v400_v54 = vpop.f32.mrb[2].mxu0  ;;  %v440_v57 = vadd.f32 %v439_v53, %v133_v46  ;;  %v441_v58 = vpop.f32.mrb[2].mxu1  ;;  %v169_v53 = vrot.slane %v3015_v10, %v136_v21 }
 0x12d   :  { %v706_v56 = vmul.f32 0.70710677, %v397_v48  ;;  %v401_v59 = vpop.f32.mrb[3].mxu0  ;;  %v708_v61 = vmul.f32 0.70710677, %v438_v51  ;;  %v442_v1 = vpop.f32.mrb[3].mxu1 }
 0x12e   :  { %v707_v62 = vmul.f32 0.70710677, %v399_v52  ;;  %v709_v63 = vmul.f32 0.70710677, %v440_v57  ;;  %v690_v24 = vmul.f32 0.5, %v397_v48  ;;  %v692_v31 = vmul.f32 0.5, %v438_v51 }
 0x12f   :  { %2690 = verf.f32 %v706_v56  ;;  %v691_v32 = vmul.f32 0.5, %v399_v52  ;;  %v693_v40 = vmul.f32 0.5, %v440_v57  ;;  %v145_v51 = vrot.slane %v2990_v39, %v144_v26  ;;  %v2596_v54 = vld [vmem:[#allocation9 + $0x100] sm:$0xff]   ;;  %v2598_v57 = vld [vmem:[#allocation9 + $0x148] sm:$0xff]  }
 0x130   :  { %2692 = verf.f32 %v708_v61  ;;  %v2597_v61 = vld [vmem:[#allocation9 + $0x180] sm:$0xff]  }
 0x131   :  { %2694 = verf.f32 %v707_v62  ;;  %v157_v62 = vrot.slane %v3015_v10, %v124_v41 }
 0x132   :  { %2696 = verf.f32 %v709_v63  ;;  %v3011_v4 = vpop.f32.mrb[4].mxu0  ;;  %v3013_v6 = vpop.f32.mrb[4].mxu1 }
 0x133   :  { %v480_v5 = vpop.f32.mrb[5].mxu0  ;;  %v521_v8 = vpop.f32.mrb[5].mxu1 }
 0x134   :  { %v481_v7 = vadd.f32 %v480_v5, %v141_v2  ;;  %v482_v9 = vpop.f32.mrb[6].mxu0  ;;  %v522_v11 = vadd.f32 %v521_v8, %v149_v3  ;;  %v523_v0 = vpop.f32.mrb[6].mxu1  ;;  %v2599_v2 = vld [vmem:[#allocation9 + $0x1c8] sm:$0xff]   ;;  %v165_v3 = vrot.slane %v3015_v10, %v132_v42  ;;  %v177_v5 = vrot.slane %v3015_v10, %v144_v26 }
 0x135   :  { %v483_v12 = vpop.f32.mrb[7].mxu0  ;;  %v524_v15 = vpop.f32.mrb[7].mxu1  ;;  %v2600_v42 = vld [vmem:[#allocation9 + $0x108] sm:$0xff]  }
 0x136   :  { %v711_v13 = vmul.f32 0.70710677, %v481_v7  ;;  %v713_v14 = vmul.f32 0.70710677, %v522_v11  ;;  %v695_v58 = vmul.f32 0.5, %v481_v7  ;;  %v3036_v7 = vadd.f32 %v3011_v4, %v137_v49  ;;  %v2615_v49 = vld [vmem:[#allocation9 + $0x1e8] sm:$0xff]  }
 0x137   :  { %v697_v9 = vmul.f32 0.5, %v522_v11  ;;  %v2601_v11 = vld [vmem:[#allocation9 + $0x188] sm:$0xff]  }
 0x138   :  { %2698 = verf.f32 %v711_v13 }
 0x139   :  { %v2691_v18 = vpop.eup %2690  ;;  %2700 = verf.f32 %v713_v14  ;;  %v3043_v14 = vadd.f32 %v3013_v6, %v145_v51  ;;  %v2617_v51 = vld [vmem:[#allocation9 + $0x1a8] sm:$0xff]  }
 0x13a   :  { %v2693_v19 = vpop.eup %2692  ;;  %v738_v20 = vadd.f32 1.0, %v2691_v18  ;;  %v560_v22 = vpop.f32.mrb[8].mxu0 }
 0x13b   :  { %v2695_v23 = vpop.eup %2694  ;;  %v740_v25 = vadd.f32 1.0, %v2693_v19  ;;  %v3021_v27 = vadd.f32 %v560_v22, %v153_v16  ;;  %v562_v28 = vpop.f32.mrb[9].mxu0  ;;  %v2603_v22 = vld [vmem:[#allocation9 + $0x1d0] sm:$0xff]  }
 0x13c   :  { %v601_v29 = vpop.f32.mrb[8].mxu1  ;;  %v2697_v30 = vpop.eup %2696  ;;  %v739_v33 = vadd.f32 1.0, %v2695_v23  ;;  %v754_v38 = vmul.f32 %v738_v20, %v690_v24  ;;  %v3047_v19 = vadd.f32 %v562_v28, %v157_v62  ;;  %v710_v24 = vmul.f32 0.70710677, %v3036_v7  ;;  %v2605_v28 = vld [vmem:[#allocation9 + $0x190] sm:$0xff]  }
 0x13d   :  { %v3023_v34 = vadd.f32 %v601_v29, %v161_v17  ;;  %v603_v35 = vpop.f32.mrb[9].mxu1  ;;  %v564_v36 = vpop.f32.mrb[10].mxu0  ;;  %v741_v43 = vadd.f32 1.0, %v2697_v30  ;;  %v756_v46 = vmul.f32 %v740_v25, %v692_v31  ;;  %v2602_v17 = vld [vmem:[#allocation9 + $0x150] sm:$0xff]   ;;  %v712_v30 = vmul.f32 0.70710677, %v3043_v14 }
 0x13e   :  { %v565_v44 = vpop.f32.mrb[11].mxu0  ;;  %v605_v45 = vpop.f32.mrb[10].mxu1  ;;  %v755_v47 = vmul.f32 %v739_v33, %v691_v32  ;;  %v771_v56 = vpack.c.bf16 %v754_v38, %v754_v38  ;;  %v3049_v6 = vadd.f32 %v603_v35, %v165_v3  ;;  %v2604_v31 = vld [vmem:[#allocation9 + $0x110] sm:$0xff]   ;;  %v2606_v32 = vld [vmem:[#allocation9 + $0x158] sm:$0xff]   ;;  %v715_v36 = vmul.f32 0.70710677, %v3047_v19 }
 0x13f   :  { %v606_v48 = vpop.f32.mrb[11].mxu1  ;;  %v757_v50 = vmul.f32 %v741_v43, %v693_v40  ;;  %v773_v1 = vpack.c.bf16 %v756_v46, %v756_v46  ;;  %v2607_v35 = vld [vmem:[#allocation9 + $0x1d8] sm:$0xff]   ;;  %2702 = verf.f32 %v710_v24  ;;  %v2610_v44 = vld [vmem:[#allocation9 + $0x160] sm:$0xff]  }
 0x140   :  { %v772_v52 = vpack.c.bf16 %v755_v47, %v755_v47  ;;  %v717_v38 = vmul.f32 0.70710677, %v3049_v6  ;;  %2704 = verf.f32 %v712_v30  ;;  %v2608_v40 = vld [vmem:[#allocation9 + $0x118] sm:$0xff]   ;;  %v2611_v45 = vld [vmem:[#allocation9 + $0x1e0] sm:$0xff]   ;;  %v2614_v48 = vld [vmem:[#allocation9 + $0x168] sm:$0xff]  }
 0x141   :  { %v774_v59 = vpack.c.bf16 %v757_v50, %v757_v50  ;;  %v2609_v43 = vld [vmem:[#allocation9 + $0x198] sm:$0xff]   ;;  %2706 = verf.f32 %v715_v36  ;;  %v2612_v46 = vld [vmem:[#allocation9 + $0x120] sm:$0xff]   ;;  %v2616_v50 = vld [vmem:[#allocation9 + $0x128] sm:$0xff]   ;;  %v714_v36 = vmul.f32 0.70710677, %v3021_v27 }
 0x142   :  { %v2699_v63 = vpop.eup %2698  ;;  %1843 = vmatprep.mubr.bf16.mxu0 %v772_v52  ;;  %v642_v39 = vpop.f32.mrb[12].mxu0  ;;  %2708 = verf.f32 %v717_v38  ;;  %v2613_v47 = vld [vmem:[#allocation9 + $0x1a0] sm:$0xff]   ;;  %v2618_v52 = vld [vmem:[#allocation9 + $0x170] sm:$0xff]   ;;  %v2632_v30 = vld [vmem:[#allocation9 + $0x208] sm:$0xff]  }
 0x143   :  { %v743_v8 = vadd.f32 1.0, %v2699_v63  ;;  %1883 = vmatprep.mubr.bf16.mxu1 %v774_v59  ;;  %1844 = vmatmul.mubr.bf16.vlgmr.msra.gmra.mrb[16].mxu0 %v771_v56  ;;  %v3038_v12 = vadd.f32 %v642_v39, %v169_v53  ;;  %v3040_v41 = vpop.f32.mrb[13].mxu0  ;;  %v683_v0 = vpop.f32.mrb[12].mxu1  ;;  %v2619_v56 = vld [vmem:[#allocation9 + $0x1f0] sm:$0xff]   ;;  %v699_v39 = vmul.f32 0.5, %v3047_v19  ;;  %v2638_v38 = vld [vmem:[#allocation9 + $0x258] sm:$0xff]   ;;  %2710 = verf.f32 %v714_v36 }
 0x144   :  { %v2701_v13 = vpop.eup %2700  ;;  %1884 = vmatmul.mubr.bf16.vlgmr.msra.gmra.mrb[16].mxu1 %v773_v1  ;;  %2418 = vmatpush3.bf16.msra.mxu0 %v2596_v54  ;;  %v3045_v15 = vpop.f32.mrb[13].mxu1  ;;  %v3052_v29 = vadd.f32 %v683_v0, %v177_v5  ;;  %v2621_v63 = vld [vmem:[#allocation9 + $0x1b0] sm:$0xff]   ;;  %v2622_v1 = vld [vmem:[#allocation9 + $0x178] sm:$0xff]  }
 0x145   :  { %v646_v4 = vpop.f32.mrb[14].mxu0  ;;  %v745_v16 = vadd.f32 1.0, %v2701_v13  ;;  %2440 = vmatpush3.bf16.msra.mxu1 %v2597_v61  ;;  %2419 = vmatprep.subr.bf16.mxu0 %v2598_v57  ;;  %v759_v18 = vmul.f32 %v743_v8, %v695_v58  ;;  %v687_v21 = vpop.f32.mrb[14].mxu1  ;;  %v2620_v61 = vld [vmem:[#allocation9 + $0x130] sm:$0xff]   ;;  %v694_v57 = vmul.f32 0.5, %v3036_v7  ;;  %v2623_v8 = vld [vmem:[#allocation9 + $0x1f8] sm:$0xff]  }
 0x146   :  { %v647_v20 = vpop.f32.mrb[15].mxu0  ;;  %2441 = vmatprep.subr.bf16.mxu1 %v2599_v2  ;;  %v688_v23 = vpop.f32.mrb[15].mxu1  ;;  %v696_v2 = vmul.f32 0.5, %v3043_v14  ;;  %v2624_v13 = vld [vmem:[#allocation9 + $0x138] sm:$0xff]   ;;  %v2626_v4 = vld [vmem:[#allocation9 + $0x240] sm:$0xff]   ;;  %v2630_v21 = vld [vmem:[#allocation9 + $0x248] sm:$0xff]  }
 0x147   :  { %v776_v25 = vpack.c.bf16 %v759_v18, %v759_v18  ;;  %v761_v26 = vmul.f32 %v745_v16, %v697_v9  ;;  %v701_v9 = vmul.f32 0.5, %v3049_v6  ;;  %v2625_v7 = vld [vmem:[#allocation9 + $0x1b8] sm:$0xff]   ;;  %v2628_v18 = vld [vmem:[#allocation9 + $0x200] sm:$0xff]   ;;  %v2631_v23 = vld [vmem:[#allocation9 + $0x2c8] sm:$0xff]  }
 0x148   :  { %2420 = vmatpush3.bf16.msra.mxu0 %v2600_v42  ;;  %v2629_v20 = vld [vmem:[#allocation9 + $0x280] sm:$0xff]   ;;  %v2671_v36 = vld [vmem:[#allocation9 + $0x3d8] sm:$0xff]  }
 0x149   :  { %2442 = vmatpush3.bf16.msra.mxu1 %v2601_v11  ;;  %2421 = vmatprep.subr.bf16.mxu0 %v2602_v17  ;;  %v778_v33 = vpack.c.bf16 %v761_v26, %v761_v26  ;;  %v2703_v53 = vpop.eup %2702  ;;  %v2627_v11 = vld [vmem:[#allocation9 + $0x2c0] sm:$0xff]  }
 0x14a   :  { %2443 = vmatprep.subr.bf16.mxu1 %v2603_v22  ;;  %1923 = vmatprep.mubr.bf16.mxu0 %v776_v25  ;;  %v2705_v54 = vpop.eup %2704  ;;  %v742_v62 = vadd.f32 1.0, %v2703_v53  ;;  %v173_v22 = vrot.slane %v3015_v10, %v140_v55  ;;  %v181_v25 = vrot.slane %v3015_v10, %v148_v60  ;;  %v2635_v55 = vld [vmem:[#allocation9 + $0x2d0] sm:$0xff]   ;;  %v716_v60 = vmul.f32 0.70710677, %v3023_v34  ;;  %v2648_v53 = vld [vmem:[#allocation9 + $0x228] sm:$0xff]  }
 0x14b   :  { %1963 = vmatprep.mubr.bf16.mxu1 %v778_v33  ;;  %v2707_v58 = vpop.eup %2706  ;;  %v744_v3 = vadd.f32 1.0, %v2705_v54  ;;  %v2636_v10 = vld [vmem:[#allocation9 + $0x210] sm:$0xff]  }
 0x14c   :  { %2422 = vmatpush3.bf16.msra.mxu0 %v2604_v31  ;;  %v2709_v59 = vpop.eup %2708  ;;  %v747_v5 = vadd.f32 1.0, %v2707_v58  ;;  %v758_v42 = vmul.f32 %v742_v62, %v694_v57  ;;  %v2633_v31 = vld [vmem:[#allocation9 + $0x288] sm:$0xff]   ;;  %v686_v33 = vadd.f32 %v3045_v15, %v181_v25  ;;  %2712 = verf.f32 %v716_v60  ;;  %v2641_v15 = vld [vmem:[#allocation9 + $0x298] sm:$0xff]   ;;  %v2650_v54 = vld [vmem:[#allocation9 + $0x270] sm:$0xff]  }
 0x14d   :  { %2444 = vmatpush3.bf16.msra.mxu1 %v2605_v28  ;;  %2423 = vmatprep.subr.bf16.mxu0 %v2606_v32  ;;  %v749_v0 = vadd.f32 1.0, %v2709_v59  ;;  %v760_v16 = vmul.f32 %v744_v3, %v696_v2  ;;  %v2634_v28 = vld [vmem:[#allocation9 + $0x250] sm:$0xff]   ;;  %v645_v32 = vadd.f32 %v3040_v41, %v173_v22  ;;  %v698_v62 = vmul.f32 0.5, %v3021_v27  ;;  %v2654_v2 = vld [vmem:[#allocation9 + $0x278] sm:$0xff]   ;;  %v2663_v22 = vld [vmem:[#allocation9 + $0x3c8] sm:$0xff]  }
 0x14e   :  { %2445 = vmatprep.subr.bf16.mxu1 %v2607_v35  ;;  %v763_v14 = vmul.f32 %v747_v5, %v699_v39  ;;  %v775_v19 = vpack.c.bf16 %v758_v42, %v758_v42  ;;  %v2637_v35 = vld [vmem:[#allocation9 + $0x290] sm:$0xff]   ;;  %v721_v41 = vmul.f32 0.70710677, %v686_v33  ;;  %v700_v3 = vmul.f32 0.5, %v3023_v34  ;;  %v2656_v42 = vld [vmem:[#allocation9 + $0x238] sm:$0xff]   ;;  %v2660_v34 = vld [vmem:[#allocation9 + $0x300] sm:$0xff]  }
 0x14f   :  { %v765_v17 = vmul.f32 %v749_v0, %v701_v9  ;;  %v777_v6 = vpack.c.bf16 %v760_v16, %v760_v16  ;;  %v2651_v58 = vld [vmem:[#allocation9 + $0x2f0] sm:$0xff]   ;;  %v703_v5 = vmul.f32 0.5, %v645_v32  ;;  %v2655_v9 = vld [vmem:[#allocation9 + $0x2f8] sm:$0xff]   ;;  %v705_v0 = vmul.f32 0.5, %v686_v33  ;;  %v2665_v25 = vld [vmem:[#allocation9 + $0x388] sm:$0xff]  }
 0x150   :  { %2424 = vmatpush3.bf16.msra.mxu0 %v2608_v40  ;;  %v780_v24 = vpack.c.bf16 %v763_v14, %v763_v14  ;;  %v719_v40 = vmul.f32 0.70710677, %v645_v32  ;;  %v2652_v57 = vld [vmem:[#allocation9 + $0x230] sm:$0xff]   ;;  %v2657_v27 = vld [vmem:[#allocation9 + $0x2b8] sm:$0xff]   ;;  %v720_v32 = vmul.f32 0.70710677, %v3052_v29 }
 0x151   :  { %2446 = vmatpush3.bf16.msra.mxu1 %v2609_v43  ;;  %2425 = vmatprep.subr.bf16.mxu0 %v2610_v44  ;;  %v782_v26 = vpack.c.bf16 %v765_v17, %v765_v17  ;;  %v2639_v43 = vld [vmem:[#allocation9 + $0x2d8] sm:$0xff]  }
 0x152   :  { %2447 = vmatprep.subr.bf16.mxu1 %v2611_v45  ;;  %v2640_v44 = vld [vmem:[#allocation9 + $0x218] sm:$0xff]   ;;  %v2642_v45 = vld [vmem:[#allocation9 + $0x260] sm:$0xff]   ;;  %2714 = verf.f32 %v719_v40 }
 0x153   :  { %2716 = verf.f32 %v721_v41  ;;  %v2670_v33 = vld [vmem:[#allocation9 + $0x358] sm:$0xff]   ;;  %v2676_v40 = vld [vmem:[#allocation9 + $0x320] sm:$0xff]   ;;  %v2678_v41 = vld [vmem:[#allocation9 + $0x368] sm:$0xff]  }
 0x154   :  { %2426 = vmatpush3.bf16.msra.mxu0 %v2612_v46  ;;  %v2643_v46 = vld [vmem:[#allocation9 + $0x2e0] sm:$0xff]   ;;  %v2672_v60 = vld [vmem:[#allocation9 + $0x318] sm:$0xff]  }
 0x155   :  { %2448 = vmatpush3.bf16.msra.mxu1 %v2613_v47  ;;  %2427 = vmatprep.subr.bf16.mxu0 %v2614_v48  ;;  %v2644_v47 = vld [vmem:[#allocation9 + $0x220] sm:$0xff]  }
 0x156   :  { %2449 = vmatprep.subr.bf16.mxu1 %v2615_v49  ;;  %v2645_v48 = vld [vmem:[#allocation9 + $0x2a0] sm:$0xff]   ;;  %v2646_v49 = vld [vmem:[#allocation9 + $0x268] sm:$0xff]  }
 0x158   :  { %2428 = vmatpush3.bf16.msra.mxu0 %v2616_v50  ;;  %v2647_v50 = vld [vmem:[#allocation9 + $0x2e8] sm:$0xff]  }
 0x159   :  { %2450 = vmatpush3.bf16.msra.mxu1 %v2617_v51  ;;  %2429 = vmatprep.subr.bf16.mxu0 %v2618_v52  ;;  %v2711_v51 = vpop.eup %2710  ;;  %v2649_v52 = vld [vmem:[#allocation9 + $0x2a8] sm:$0xff]  }
 0x15a   :  { %2451 = vmatprep.subr.bf16.mxu1 %v2619_v56  ;;  %v2713_v56 = vpop.eup %2712 }
 0x15b   :  { %v748_v39 = vadd.f32 1.0, %v2713_v56  ;;  %v704_v56 = vmul.f32 0.5, %v3052_v29 }
 0x15c   :  { %2430 = vmatpush3.bf16.msra.mxu0 %v2620_v61  ;;  %v2715_v59 = vpop.eup %2714 }
 0x15d   :  { %2452 = vmatpush3.bf16.msra.mxu1 %v2621_v63  ;;  %2431 = vmatprep.subr.bf16.mxu0 %v2622_v1  ;;  %v2717_v61 = vpop.eup %2716  ;;  %v746_v63 = vadd.f32 1.0, %v2711_v51  ;;  %v2653_v1 = vld [vmem:[#allocation9 + $0x2b0] sm:$0xff]   ;;  %v764_v16 = vmul.f32 %v748_v39, %v700_v3 }
 0x15e   :  { %2453 = vmatprep.subr.bf16.mxu1 %v2623_v8  ;;  %v751_v8 = vadd.f32 1.0, %v2715_v59  ;;  %v2687_v59 = vld [vmem:[#allocation9 + $0x3f8] sm:$0xff]  }
 0x160   :  { %2432 = vmatpush3.bf16.msra.mxu0 %v2624_v13  ;;  %v753_v13 = vadd.f32 1.0, %v2717_v61  ;;  %v767_v14 = vmul.f32 %v751_v8, %v703_v5  ;;  %v2688_v61 = vld [vmem:[#allocation9 + $0x338] sm:$0xff]  }
 0x161   :  { %2454 = vmatpush3.bf16.msra.mxu1 %v2625_v7  ;;  %2461 = vmatprep.subr.bf16.mxu0 %v2626_v4  ;;  %v762_v7 = vmul.f32 %v746_v63, %v698_v62  ;;  %v2658_v4 = vld [vmem:[#allocation9 + $0x340] sm:$0xff]   ;;  %v2689_v62 = vld [vmem:[#allocation9 + $0x3b8] sm:$0xff]  }
 0x162   :  { %2483 = vmatprep.subr.bf16.mxu1 %v2627_v11  ;;  %v2659_v11 = vld [vmem:[#allocation9 + $0x3c0] sm:$0xff]   ;;  %v769_v17 = vmul.f32 %v753_v13, %v705_v0 }
 0x163   :  { %1924 = vmatmul.mubr.bf16.vlgmr.msra.gmra.mrb[20].mxu0 %v775_v19  ;;  %v2661_v19 = vld [vmem:[#allocation9 + $0x380] sm:$0xff]  }
 0x164   :  { %1964 = vmatmul.mubr.bf16.vlgmr.msra.gmra.mrb[20].mxu1 %v777_v6  ;;  %2462 = vmatpush3.bf16.msra.mxu0 %v2628_v18  ;;  %v779_v18 = vpack.c.bf16 %v762_v7, %v762_v7  ;;  %v784_v6 = vpack.c.bf16 %v767_v14, %v767_v14 }
 0x165   :  { %2484 = vmatpush3.bf16.msra.mxu1 %v2629_v20  ;;  %2463 = vmatprep.subr.bf16.mxu0 %v2630_v21  ;;  %v2662_v20 = vld [vmem:[#allocation9 + $0x348] sm:$0xff]   ;;  %v781_v21 = vpack.c.bf16 %v764_v16, %v764_v16 }
 0x166   :  { %2485 = vmatprep.subr.bf16.mxu1 %v2631_v23  ;;  %2003 = vmatprep.mubr.bf16.mxu0 %v780_v24  ;;  %v786_v23 = vpack.c.bf16 %v769_v17, %v769_v17  ;;  %v2664_v24 = vld [vmem:[#allocation9 + $0x308] sm:$0xff]  }
 0x167   :  { %2043 = vmatprep.mubr.bf16.mxu1 %v782_v26  ;;  %v2666_v26 = vld [vmem:[#allocation9 + $0x350] sm:$0xff]  }
 0x168   :  { %2464 = vmatpush3.bf16.msra.mxu0 %v2632_v30  ;;  %v2667_v30 = vld [vmem:[#allocation9 + $0x3d0] sm:$0xff]  }
 0x169   :  { %2486 = vmatpush3.bf16.msra.mxu1 %v2633_v31  ;;  %2465 = vmatprep.subr.bf16.mxu0 %v2634_v28  ;;  %v718_v31 = vmul.f32 0.70710677, %v3038_v12  ;;  %v2668_v28 = vld [vmem:[#allocation9 + $0x310] sm:$0xff]  }
 0x16a   :  { %2487 = vmatprep.subr.bf16.mxu1 %v2635_v55  ;;  %v2669_v55 = vld [vmem:[#allocation9 + $0x390] sm:$0xff]  }
 0x16b   :  { %2718 = verf.f32 %v718_v31 }
 0x16c   :  { %2466 = vmatpush3.bf16.msra.mxu0 %v2636_v10  ;;  %2720 = verf.f32 %v720_v32  ;;  %v2673_v10 = vld [vmem:[#allocation9 + $0x398] sm:$0xff]  }
 0x16d   :  { %2488 = vmatpush3.bf16.msra.mxu1 %v2637_v35  ;;  %2467 = vmatprep.subr.bf16.mxu0 %v2638_v38  ;;  %v2674_v35 = vld [vmem:[#allocation9 + $0x360] sm:$0xff]  }
 0x16e   :  { %2489 = vmatprep.subr.bf16.mxu1 %v2639_v43  ;;  %v2675_v38 = vld [vmem:[#allocation9 + $0x3e0] sm:$0xff]  }
 0x16f   :  { %v2677_v43 = vld [vmem:[#allocation9 + $0x3a0] sm:$0xff]  }
 0x170   :  { %2468 = vmatpush3.bf16.msra.mxu0 %v2640_v44  ;;  %v2679_v44 = vld [vmem:[#allocation9 + $0x3e8] sm:$0xff]  }
 0x171   :  { %2490 = vmatpush3.bf16.msra.mxu1 %v2641_v15  ;;  %2469 = vmatprep.subr.bf16.mxu0 %v2642_v45  ;;  %v2680_v15 = vld [vmem:[#allocation9 + $0x328] sm:$0xff]  }
 0x172   :  { %2491 = vmatprep.subr.bf16.mxu1 %v2643_v46  ;;  %v2681_v45 = vld [vmem:[#allocation9 + $0x3a8] sm:$0xff]   ;;  %v2682_v46 = vld [vmem:[#allocation9 + $0x370] sm:$0xff]  }
 0x174   :  { %2470 = vmatpush3.bf16.msra.mxu0 %v2644_v47 }
 0x175   :  { %2492 = vmatpush3.bf16.msra.mxu1 %v2645_v48  ;;  %2471 = vmatprep.subr.bf16.mxu0 %v2646_v49  ;;  %v2719_v47 = vpop.eup %2718  ;;  %v2683_v48 = vld [vmem:[#allocation9 + $0x3f0] sm:$0xff]  }
 0x176   :  { %2493 = vmatprep.subr.bf16.mxu1 %v2647_v50  ;;  %v2721_v49 = vpop.eup %2720  ;;  %v2684_v50 = vld [vmem:[#allocation9 + $0x330] sm:$0xff]   ;;  %v750_v51 = vadd.f32 1.0, %v2719_v47  ;;  %v2372_v47 = vld [vmem:[%s3109_s4] ss:$0 sm:$0xff] }
 0x178   :  { %2472 = vmatpush3.bf16.msra.mxu0 %v2648_v53  ;;  %v702_v53 = vmul.f32 0.5, %v3038_v12 }
 0x179   :  { %2494 = vmatpush3.bf16.msra.mxu1 %v2649_v52  ;;  %2473 = vmatprep.subr.bf16.mxu0 %v2650_v54  ;;  %v2685_v52 = vld [vmem:[#allocation9 + $0x3b0] sm:$0xff]   ;;  %v2686_v54 = vld [vmem:[#allocation9 + $0x378] sm:$0xff]  }
 0x17a   :  { %2495 = vmatprep.subr.bf16.mxu1 %v2651_v58  ;;  %v752_v58 = vadd.f32 1.0, %v2721_v49 }
 0x17c   :  { %2474 = vmatpush3.bf16.msra.mxu0 %v2652_v57  ;;  %v766_v57 = vmul.f32 %v750_v51, %v702_v53  ;;  %v768_v63 = vmul.f32 %v752_v58, %v704_v56 }
 0x17d   :  { %2496 = vmatpush3.bf16.msra.mxu1 %v2653_v1  ;;  %2475 = vmatprep.subr.bf16.mxu0 %v2654_v2 }
 0x17e   :  { %2497 = vmatprep.subr.bf16.mxu1 %v2655_v9  ;;  %v783_v12 = vpack.c.bf16 %v766_v57, %v766_v57  ;;  %v785_v1 = vpack.c.bf16 %v768_v63, %v768_v63 }
 0x180   :  { %2476 = vmatpush3.bf16.msra.mxu0 %v2656_v42 }
 0x181   :  { %2498 = vmatpush3.bf16.msra.mxu1 %v2657_v27  ;;  %2505 = vmatprep.subr.bf16.mxu0 %v2658_v4 }
 0x182   :  { %2527 = vmatprep.subr.bf16.mxu1 %v2659_v11 }
 0x183   :  { %2004 = vmatmul.mubr.bf16.vlgmr.msra.gmra.mrb[24].mxu0 %v779_v18 }
 0x184   :  { %2044 = vmatmul.mubr.bf16.vlgmr.msra.gmra.mrb[24].mxu1 %v781_v21  ;;  %2506 = vmatpush3.bf16.msra.mxu0 %v2660_v34 }
 0x185   :  { %2528 = vmatpush3.bf16.msra.mxu1 %v2661_v19  ;;  %2507 = vmatprep.subr.bf16.mxu0 %v2662_v20 }
 0x186   :  { %2529 = vmatprep.subr.bf16.mxu1 %v2663_v22  ;;  %2083 = vmatprep.mubr.bf16.mxu0 %v784_v6 }
 0x187   :  { %2123 = vmatprep.mubr.bf16.mxu1 %v786_v23 }
 0x188   :  { %2508 = vmatpush3.bf16.msra.mxu0 %v2664_v24 }
 0x189   :  { %2530 = vmatpush3.bf16.msra.mxu1 %v2665_v25  ;;  %2509 = vmatprep.subr.bf16.mxu0 %v2666_v26 }
 0x18a   :  { %2531 = vmatprep.subr.bf16.mxu1 %v2667_v30 }
 0x18c   :  { %2510 = vmatpush3.bf16.msra.mxu0 %v2668_v28 }
 0x18d   :  { %2532 = vmatpush3.bf16.msra.mxu1 %v2669_v55  ;;  %2511 = vmatprep.subr.bf16.mxu0 %v2670_v33 }
 0x18e   :  { %2533 = vmatprep.subr.bf16.mxu1 %v2671_v36 }
 0x190   :  { %2512 = vmatpush3.bf16.msra.mxu0 %v2672_v60 }
 0x191   :  { %2534 = vmatpush3.bf16.msra.mxu1 %v2673_v10  ;;  %2513 = vmatprep.subr.bf16.mxu0 %v2674_v35 }
 0x192   :  { %2535 = vmatprep.subr.bf16.mxu1 %v2675_v38 }
 0x194   :  { %2514 = vmatpush3.bf16.msra.mxu0 %v2676_v40 }
 0x195   :  { %2536 = vmatpush3.bf16.msra.mxu1 %v2677_v43  ;;  %2515 = vmatprep.subr.bf16.mxu0 %v2678_v41 }
 0x196   :  { %2537 = vmatprep.subr.bf16.mxu1 %v2679_v44 }
 0x198   :  { %2516 = vmatpush3.bf16.msra.mxu0 %v2680_v15 }
 0x199   :  { %2538 = vmatpush3.bf16.msra.mxu1 %v2681_v45  ;;  %2517 = vmatprep.subr.bf16.mxu0 %v2682_v46 }
 0x19a   :  { %2539 = vmatprep.subr.bf16.mxu1 %v2683_v48 }
 0x19c   :  { %2518 = vmatpush3.bf16.msra.mxu0 %v2684_v50  ;;  %v2872_v50 = vmov 0.0  }
 0x19d   :  { %2540 = vmatpush3.bf16.msra.mxu1 %v2685_v52  ;;  %2519 = vmatprep.subr.bf16.mxu0 %v2686_v54 }
 0x19e   :  { %2541 = vmatprep.subr.bf16.mxu1 %v2687_v59 }
 0x1a0   :  { %2520 = vmatpush3.bf16.msra.mxu0 %v2688_v61 }
 0x1a1   :  { %2542 = vmatpush3.bf16.msra.mxu1 %v2689_v62 }
 0x1a3   :  { %2084 = vmatmul.mubr.bf16.vlgmr.msra.gmra.mrb[28].mxu0 %v783_v12 }
 0x1a4   :  { %2124 = vmatmul.mubr.bf16.vlgmr.msra.gmra.mrb[28].mxu1 %v785_v1 }
 0x216   :  { %v2389_v2 = vpop.f32.mrb[16].mxu0 }
 0x217   :  { %v2411_v3 = vpop.f32.mrb[16].mxu1  ;;  %v2390_v29 = vpop.f32.mrb[17].mxu0 }
 0x218   :  { %v2391_v39 = vadd.f32 %v2390_v29, %v2389_v2  ;;  %v2412_v5 = vpop.f32.mrb[17].mxu1  ;;  %v2392_v8 = vpop.f32.mrb[18].mxu0 }
 0x219   :  { %v2413_v9 = vadd.f32 %v2412_v5, %v2411_v3  ;;  %v2414_v0 = vpop.f32.mrb[18].mxu1  ;;  %v2393_v13 = vpop.f32.mrb[19].mxu0 }
 0x21a   :  { %v2415_v42 = vpop.f32.mrb[19].mxu1 }
 0x21b   :  { %v1886_v7 = vadd.f32 %v2413_v9, %v2391_v39 }
 0x236   :  { %v2433_v27 = vpop.f32.mrb[20].mxu0 }
 0x237   :  { %v2455_v4 = vpop.f32.mrb[20].mxu1  ;;  %v2434_v16 = vpop.f32.mrb[21].mxu0 }
 0x238   :  { %v2435_v11 = vadd.f32 %v2434_v16, %v2433_v27  ;;  %v2456_v14 = vpop.f32.mrb[21].mxu1  ;;  %v2436_v17 = vpop.f32.mrb[22].mxu0 }
 0x239   :  { %v2457_v34 = vadd.f32 %v2456_v14, %v2455_v4  ;;  %v2458_v18 = vpop.f32.mrb[22].mxu1  ;;  %v2437_v19 = vpop.f32.mrb[23].mxu0 }
 0x23a   :  { %v1926_v20 = vadd.f32 %v2435_v11, %v1886_v7  ;;  %v2459_v21 = vpop.f32.mrb[23].mxu1 }
 0x23c   :  { %v1966_v22 = vadd.f32 %v2457_v34, %v1926_v20 }
 0x256   :  { %v2477_v6 = vpop.f32.mrb[24].mxu0 }
 0x257   :  { %v2499_v23 = vpop.f32.mrb[24].mxu1  ;;  %v2478_v24 = vpop.f32.mrb[25].mxu0 }
 0x258   :  { %v2479_v25 = vadd.f32 %v2478_v24, %v2477_v6  ;;  %v2500_v26 = vpop.f32.mrb[25].mxu1  ;;  %v2480_v30 = vpop.f32.mrb[26].mxu0 }
 0x259   :  { %v2501_v31 = vadd.f32 %v2500_v26, %v2499_v23  ;;  %v2502_v28 = vpop.f32.mrb[26].mxu1  ;;  %v2481_v32 = vpop.f32.mrb[27].mxu0 }
 0x25a   :  { %v2006_v55 = vadd.f32 %v2479_v25, %v1966_v22  ;;  %v2503_v33 = vpop.f32.mrb[27].mxu1 }
 0x25c   :  { %v2046_v36 = vadd.f32 %v2501_v31, %v2006_v55 }
 0x276   :  { %v2521_v60 = vpop.f32.mrb[28].mxu0 }
 0x277   :  { %v2543_v10 = vpop.f32.mrb[28].mxu1  ;;  %v2522_v35 = vpop.f32.mrb[29].mxu0 }
 0x278   :  { %v2523_v38 = vadd.f32 %v2522_v35, %v2521_v60  ;;  %v2544_v40 = vpop.f32.mrb[29].mxu1  ;;  %v2524_v43 = vpop.f32.mrb[30].mxu0 }
 0x279   :  { %v2545_v41 = vadd.f32 %v2544_v40, %v2543_v10  ;;  %v2546_v44 = vpop.f32.mrb[30].mxu1  ;;  %v2525_v15 = vpop.f32.mrb[31].mxu0 }
 0x27a   :  { %v2086_v45 = vadd.f32 %v2523_v38, %v2046_v36  ;;  %v2547_v46 = vpop.f32.mrb[31].mxu1 }
 0x27c   :  { %v2126_v48 = vadd.f32 %v2545_v41, %v2086_v45 }
 0x27e   :  { %v2144_v49 = vadd.f32 %v2372_v47, %v2126_v48 }
 0x280   :  { %vm2145_vm1 = vcmp.gt.f32.partialorder %v2144_v49, 0.5 }
 0x281   :  { %v2146_v53 = vsel %vm2145_vm1, 1.0, %v2872_v50 }
 0x282   :  { %v2155_v51 = vsub.f32 %v2146_v53, %v2144_v49  ;;  %v2147_v52 = vpack.c.bf16 %v2146_v53, %v2146_v53 }
 0x284   :  { %v2156_v54 = vmul.f32 %v2155_v51, %v2155_v51  ;;  %2148 = vst [vmem:[#allocation11] sm:$0xf] %v2147_v52 }
 0x286   :  { %v2159_v56 = vsel %vm2154_vm2, %v2156_v54, 0.0 }
 0x287   :  { %2160 = vadd.xlane.f32.xlu0 %v2159_v56 }
 0x288   :  { %2821 = shalt.err (!%p2818_p8)
}
 0x289   :  { %s2822_s25 = scalar_lea.hbm %s3110_s5, 64 }
 0x28a   :  { %p2823_p9 = scmp.ne.s32.totalorder %s3110_s5, %s2822_s25  ;;  %p2826_p10 = scmp.lt.u32.totalorder %s2822_s25, %s3110_s5 }
 0x28c   :  { %p2828_p11 = pnand %p2826_p10, %p2823_p9 }
 0x28e   :  { %2831 = shalt.err (!%p2828_p11)
}
 0x28f   :  { %2182 = dma.vmem_to_hbm [thread:$0]  %s2180_s22, 64, %s3110_s5, [#allocation5]  }
 0x290   :  { %s2874_s0 = smov [#allocation12]  }
 0x291   :  { %s2189_s9 = sshll.u32 %s2874_s0, 4  ;;  %s2190_s9 = int_to_ptr.vmem [resolvable:$true] %s2189_s9 }
 0x292   :  { %s2832_s12 = scalar_lea.vmem %s2190_s9, 128  ;;  %p2837_p13 = scmp.lt.s32.totalorder %s2190_s9, %s2190_s9 }
 0x293   :  { %p2833_p12 = scmp.ne.s32.totalorder %s2190_s9, %s2832_s12  ;;  %p2838_p0 = scmp.lt.s32.totalorder %s2832_s12, %s2832_s12 }
 0x295   :  { %p2839_p1 = por %p2838_p0, %p2837_p13 }
 0x297   :  { %p2840_p2 = pnand %p2839_p1, %p2833_p12 }
 0x314   :  { %v2161_v37 = vpop.xlane.xlu0 %2160 }
 0x315   :  { %v2162_v58 = vrot.slane %v2161_v37, 4 }
 0x317   :  { %v2163_v59 = vadd.f32 %v2162_v58, %v2161_v37 }
 0x319   :  { %v2164_v61 = vrot.slane %v2163_v59, 2 }
 0x31b   :  { %v2165_v57 = vadd.f32 %v2164_v61, %v2163_v59 }
 0x31d   :  { %v2166_v62 = vrot.slane %v2165_v57, 1 }
 0x31f   :  { %v2167_v63 = vadd.f32 %v2166_v62, %v2165_v57 }
 0x321   :  { %2549 = vpush %v2167_v63 }
 0x352   :  { %s2550_s10 = spop %2549 }
 0x353   :  { %s2169_s11 = smul.f32 0.0009765625, %s2550_s10 }
 0x355   :  { %v2170_v12 = vstv %s2169_s11 }
 0x356   :  { %2172 = vst [vmem:[#allocation12] sm:$0xff] %v2170_v12 }
 0x357   :  { %2843 = shalt.err (!%p2840_p2)
}
 0x358   :  { %s2844_s15 = scalar_lea.hbm %s3111_s6, 128 }
 0x359   :  { %p2845_p3 = scmp.ne.s32.totalorder %s3111_s6, %s2844_s15  ;;  %p2848_p4 = scmp.lt.u32.totalorder %s2844_s15, %s3111_s6 }
 0x35b   :  { %p2850_p5 = pnand %p2848_p4, %p2845_p3 }
 0x35d   :  { %2853 = shalt.err (!%p2850_p5)
}
 0x35e   :  { %2192 = dma.vmem_to_hbm [thread:$0]  %s2190_s9, 128, %s3111_s6, [#allocation13]  }
 0x35f   :  { %2860 = dma.done.wait [#allocation5], 64  }
 0x360   :  { %2861 = vsyncadd [#allocation5], 4294967232 }
 0x361   :  { %2862 = dma.done.wait [#allocation13], 128  }
 0x362   :  { %2863 = vsyncadd [#allocation13], 4294967168 }
 0x363   :  { %2199 = vsyncpa [#allocation4], 1 }
 0x364   :  { %2200 = vsyncpa [#allocation7], 1 }
 0x365   :  { %2201 = vsyncpa [#allocation10], 1 }
 0x366   :  { %2202 = vsyncpa [#allocation5], 1 }
 0x367   :  { %2203 = vsyncpa [#allocation13], 1 }

</bundles_post_ra>
